<compile_context>
chip_gen: v7x
topology: tpu7x:2x2x1
jax: 0.10.0
libtpu: 0.0.40
codegen_flags: <defaults>
</compile_context>

<pallas_src>
import functools

import jax
import jax.numpy as jnp
from jax import lax
from jax.experimental import pallas as pl
from jax.experimental.pallas import tpu as pltpu

_EPS = 1e-12  # torch.nn.functional.normalize default eps


def _arcsin_poly(x):
    # arcsin for x in [0, 1] via Abramowitz & Stegun 4.4.45 (|err| <= 2e-8,
    # below f32 resolution here) using only mul/add/sqrt, which lower in Mosaic.
    # TODO(synk): replace with jnp.arcsin if/when lax.asin_p has a Mosaic lowering.
    p = jnp.float32(-0.0012624911)
    p = p * x + jnp.float32(0.0066700901)
    p = p * x + jnp.float32(-0.0170881256)
    p = p * x + jnp.float32(0.0308918810)
    p = p * x + jnp.float32(-0.0501743046)
    p = p * x + jnp.float32(0.0889789874)
    p = p * x + jnp.float32(-0.2145988016)
    p = p * x + jnp.float32(1.5707963050)
    return jnp.float32(jnp.pi / 2) - jnp.sqrt(jnp.maximum(1.0 - x, 0.0)) * p


def _prompt_kernel(n_total, inv_nm, w_ref, x_ref, en_ref, esq4_ref, o_ref, acc_ref):
    # w_ref:   (1,1) SMEM scalar weight
    # x_ref:   [TN, D] VMEM tile of `input` (streamed over the grid)
    # en_ref:  [M, D]  VMEM pre-normalized embed (resident across the grid)
    # esq4_ref:[1, M]  VMEM 0.25 * ||en_j||^2 (resident)
    # acc_ref: (1,1)   VMEM running sum of dists over all (i, j) pairs
    i = pl.program_id(0)

    @pl.when(i == 0)
    def _():
        acc_ref[...] = jnp.zeros_like(acc_ref)

    x = x_ref[...].astype(jnp.float32)                          # [TN, D]
    tn = x.shape[0]

    # Mask rows of the (possibly ragged) last tile so padded garbage cannot
    # inject NaN/Inf into the reduction.
    row_ids = i * tn + lax.broadcasted_iota(jnp.int32, (tn, 1), 0)
    valid = row_ids < n_total                                   # [TN, 1]
    x = jnp.where(valid, x, 0.0)

    # F.normalize(dim=-1): x * (1 / max(||x||, eps)) via rsqrt (EUP slot).
    ss = jnp.sum(x * x, axis=1, keepdims=True)                  # [TN, 1]
    inv = lax.rsqrt(jnp.maximum(ss, _EPS * _EPS))
    xn = x * inv
    # ||xn||^2 / 4 recovered exactly (handles eps-degenerate rows) without a
    # second [TN, D] reduction.
    xsq4 = 0.25 * (ss * (inv * inv))                            # [TN, 1]

    # pairwise (||xn_i - en_j|| / 2) via sqrt((||xn||^2 + ||en||^2 - 2<xn,en>)/4)
    # TODO(synk): optionally cast xn/en to bf16 here for the v6e/v7x MXU when
    # inputs tolerate it (keep preferred_element_type=f32).
    dot = lax.dot_general(xn, en_ref[...], (((1,), (1,)), ((), ())),
                          preferred_element_type=jnp.float32)   # [TN, M]
    half = jnp.sqrt(jnp.maximum(xsq4 + esq4_ref[...] - 0.5 * dot, 0.0))

    # dists = arcsin(||.||/2)^2 * 2
    dists = 2.0 * jnp.square(_arcsin_poly(half))                # [TN, M]

    row_sums = jnp.sum(dists, axis=1, keepdims=True)            # [TN, 1]
    row_sums = jnp.where(valid, row_sums, 0.0)
    acc_ref[...] += jnp.sum(row_sums, axis=0, keepdims=True)    # [1, 1]

    @pl.when(i == pl.num_programs(0) - 1)
    def _():
        # |w| * sign(w) * mean == w * mean ; mean uses the FULL N*M, not per-tile.
        o_ref[...] = w_ref[0, 0] * acc_ref[...] * jnp.float32(inv_nm)


def prompt_forward(inp, embed, weight=1.0, stop=float("-inf"), block_n=512):
    """Pallas equivalent of Prompt(embed, weight, stop).forward(inp)."""
    # TODO(synk): `stop` / ReplaceGrad only change the backward pass; forward
    # is identity so they are intentionally ignored here.
    del stop
    n, d = inp.shape
    m = embed.shape[0]

    # Normalize embed once in the wrapper (resident operand), and ship its
    # squared norms / 4 as a tiny (1, M) row so the kernel never re-reduces it.
    embed = embed.astype(jnp.float32)
    en = embed / jnp.maximum(
        jnp.sqrt(jnp.sum(embed * embed, axis=-1, keepdims=True)), _EPS)
    esq4 = 0.25 * jnp.sum(en * en, axis=-1)[None, :]            # (1, M)

    # Tile N; block rows must be a multiple of 8 (or equal full N).
    assert block_n % 8 == 0
    tn = n if n <= block_n else block_n
    grid = (pl.cdiv(n, tn),)

    w = jnp.asarray(weight, jnp.float32).reshape(1, 1)
    kernel = functools.partial(_prompt_kernel, n, 1.0 / (n * m))

    out = pl.pallas_call(
        kernel,
        out_shape=jax.ShapeDtypeStruct((1, 1), jnp.float32),
        grid_spec=pltpu.PrefetchScalarGridSpec(
            num_scalar_prefetch=0,
            grid=grid,
            in_specs=[
                pl.BlockSpec(memory_space=pltpu.MemorySpace.SMEM),  # weight
                pl.BlockSpec((tn, d), lambda i: (i, 0)),            # input tile
                pl.BlockSpec((m, d), lambda i: (0, 0)),             # embed (resident)
                pl.BlockSpec((1, m), lambda i: (0, 0)),             # 0.25*||en||^2
            ],
            out_specs=pl.BlockSpec((1, 1), lambda i: (0, 0)),
            scratch_shapes=[pltpu.VMEM((1, 1), jnp.float32)],
        ),
        # Reduction axis with a resident accumulator -> "arbitrary".
        # TODO(synk): on v7x, split N over a leading size-2 "parallel" core axis
        # with per-core partial sums to engage the second TensorCore.
        compiler_params=pltpu.CompilerParams(
            dimension_semantics=("arbitrary",)),
    )(w, inp, en, esq4)
    return out[0, 0]


def prompt_forward_ref(inp, embed, weight=1.0):
    """Pure-JAX reference mirroring the PyTorch module."""
    xn = inp / jnp.maximum(jnp.linalg.norm(inp, axis=-1, keepdims=True), _EPS)
    en = embed / jnp.maximum(jnp.linalg.norm(embed, axis=-1, keepdims=True), _EPS)
    dnorm = jnp.linalg.norm(xn[:, None, :] - en[None, :, :], axis=2)
    dists = 2.0 * jnp.arcsin(dnorm / 2.0) ** 2
    wgt = jnp.asarray(weight, jnp.float32)
    dists = dists * jnp.sign(wgt)
    return jnp.abs(wgt) * dists.mean()


if __name__ == "__main__":
    key = jax.random.PRNGKey(0)
    k1, k2 = jax.random.split(key)

    # N cutout embeddings vs M prompt embeddings of dim D; N=20 with block_n=8
    # exercises the multi-step grid AND the ragged (masked) last tile.
    N, M, D = 20, 4, 128
    x = jax.random.normal(k1, (N, D), dtype=jnp.float32)
    embed = jax.random.normal(k2, (M, D), dtype=jnp.float32)

    for weight in (1.0, -0.7):
        out = jax.block_until_ready(prompt_forward(x, embed, weight=weight, block_n=8))
        ref = prompt_forward_ref(x, embed, weight=weight)
        assert jnp.allclose(out, ref, rtol=1e-5, atol=1e-6), (out, ref)

    # Single-tile path (N <= block_n).
    out = jax.block_until_ready(prompt_forward(x[:8], embed, weight=1.0))
    ref = prompt_forward_ref(x[:8], embed, weight=1.0)
    assert jnp.allclose(out, ref, rtol=1e-5, atol=1e-6), (out, ref)

    print("KERNEL_OK")
</pallas_src>

<mosaic_0001>
module attributes {stable_mosaic.version = 11 : i64} {
  func.func @_prompt_kernel(%arg0: i32, %arg1: memref<1x1xf32, #tpu.memory_space<smem>>, %arg2: memref<8x128xf32, #tpu.memory_space<vmem>>, %arg3: memref<4x128xf32, #tpu.memory_space<vmem>>, %arg4: memref<1x4xf32, #tpu.memory_space<vmem>>, %arg5: memref<1x1xf32, #tpu.memory_space<vmem>>, %arg6: memref<1x1xf32, #tpu.memory_space<vmem>>) attributes {dimension_semantics = [#tpu.dimension_semantics<arbitrary>], iteration_bounds = array<i64: 3>, scalar_prefetch = 0 : i64, scratch_operands = 1 : i64, tpu.core_type = #tpu.core_type<tc>, window_params = [{transform_indices = @transform_0, window_bounds = array<i64: 1, 1>}, {transform_indices = @transform_1, window_bounds = array<i64: 8, 128>}, {pipeline_mode = #tpu.pipeline_mode<synchronous>, transform_indices = @transform_2, window_bounds = array<i64: 4, 128>}, {pipeline_mode = #tpu.pipeline_mode<synchronous>, transform_indices = @transform_3, window_bounds = array<i64: 1, 4>}, {pipeline_mode = #tpu.pipeline_mode<synchronous>, transform_indices = @transform_4, window_bounds = array<i64: 1, 1>}]} {
    %c0_i32 = arith.constant 0 : i32
    %0 = arith.cmpi eq, %arg0, %c0_i32 : i32
    %1 = arith.extui %0 : i1 to i32
    %c0_i32_0 = arith.constant 0 : i32
    %2 = arith.cmpi ne, %1, %c0_i32_0 : i32
    scf.if %2 {
      %cst_32 = arith.constant 0.000000e+00 : f32
      %83 = vector.broadcast %cst_32 : f32 to vector<1x1xf32>
      %c0_33 = arith.constant 0 : index
      %c0_34 = arith.constant 0 : index
      %84 = vector.load %arg6[%c0_33, %c0_34] : memref<1x1xf32, #tpu.memory_space<vmem>>, vector<1x1xf32>
      tpu.vector_store %arg6[%c0_33, %c0_34], %83 {strides = array<i32>} : memref<1x1xf32, #tpu.memory_space<vmem>>, vector<1x1xf32>,
    } else {
    }
    %c0 = arith.constant 0 : index
    %c0_1 = arith.constant 0 : index
    %3 = vector.load %arg2[%c0, %c0_1] : memref<8x128xf32, #tpu.memory_space<vmem>>, vector<8x128xf32>
    %c8_i32 = arith.constant 8 : i32
    %4 = arith.muli %arg0, %c8_i32 : i32
    %5 = tpu.iota {dimensions = array<i32: 0>} : vector<8x1xi32>
    %6 = vector.broadcast %4 : i32 to vector<8x1xi32>
    %7 = arith.addi %6, %5 : vector<8x1xi32>
    %c20_i32 = arith.constant 20 : i32
    %8 = vector.broadcast %c20_i32 : i32 to vector<8x1xi32>
    %9 = arith.cmpi slt, %7, %8 : vector<8x1xi32>
    %cst = arith.constant 0.000000e+00 : f32
    %10 = vector.shape_cast %9 : vector<8x1xi1> to vector<8x1xi1>
    %11 = vector.broadcast %10 : vector<8x1xi1> to vector<8x128xi1>
    %12 = vector.broadcast %cst : f32 to vector<8x128xf32>
    %13 = arith.select %11, %3, %12 : vector<8x128xi1>, vector<8x128xf32>
    %14 = arith.mulf %13, %13 : vector<8x128xf32>
    %cst_2 = arith.constant dense<0.000000e+00> : vector<8xf32>
    %15 = vector.multi_reduction <add>, %14, %cst_2 [1] : vector<8x128xf32> to vector<8xf32>
    %16 = vector.shape_cast %15 : vector<8xf32> to vector<8x1xf32>
    %cst_3 = arith.constant 1.000000e-24 : f32
    %17 = vector.broadcast %cst_3 : f32 to vector<8x1xf32>
    %18 = arith.maximumf %16, %17 : vector<8x1xf32>
    %19 = math.rsqrt %18 : vector<8x1xf32>
    %20 = vector.broadcast %19 : vector<8x1xf32> to vector<8x128xf32>
    %21 = arith.mulf %13, %20 : vector<8x128xf32>
    %22 = arith.mulf %19, %19 : vector<8x1xf32>
    %23 = arith.mulf %16, %22 : vector<8x1xf32>
    %cst_4 = arith.constant 2.500000e-01 : f32
    %24 = vector.broadcast %cst_4 : f32 to vector<8x1xf32>
    %25 = arith.mulf %24, %23 : vector<8x1xf32>
    %c0_5 = arith.constant 0 : index
    %c0_6 = arith.constant 0 : index
    %26 = vector.load %arg3[%c0_5, %c0_6] : memref<4x128xf32, #tpu.memory_space<vmem>>, vector<4x128xf32>
    %cst_7 = arith.constant dense<0.000000e+00> : vector<8x4xf32>
    %27 = tpu.matmul %21, %26, %cst_7 {dimension_numbers = #tpu.dot_dimension_numbers<[1], [1], [0], [0], [0, 0, 1, 0], [], []>} : vector<8x128xf32>, vector<4x128xf32>, vector<8x4xf32> -> vector<8x4xf32>
    %c0_8 = arith.constant 0 : index
    %c0_9 = arith.constant 0 : index
    %28 = vector.load %arg4[%c0_8, %c0_9] : memref<1x4xf32, #tpu.memory_space<vmem>>, vector<1x4xf32>
    %29 = vector.broadcast %25 : vector<8x1xf32> to vector<8x4xf32>
    %30 = vector.broadcast %28 : vector<1x4xf32> to vector<8x4xf32>
    %31 = arith.addf %29, %30 : vector<8x4xf32>
    %cst_10 = arith.constant 5.000000e-01 : f32
    %32 = vector.broadcast %cst_10 : f32 to vector<8x4xf32>
    %33 = arith.mulf %32, %27 : vector<8x4xf32>
    %34 = arith.subf %31, %33 : vector<8x4xf32>
    %cst_11 = arith.constant 0.000000e+00 : f32
    %35 = vector.broadcast %cst_11 : f32 to vector<8x4xf32>
    %36 = arith.maximumf %34, %35 : vector<8x4xf32>
    %37 = math.sqrt %36 : vector<8x4xf32>
    %cst_12 = arith.constant -0.0012624911 : f32
    %38 = vector.broadcast %cst_12 : f32 to vector<8x4xf32>
    %39 = arith.mulf %38, %37 : vector<8x4xf32>
    %cst_13 = arith.constant 6.670090e-03 : f32
    %40 = vector.broadcast %cst_13 : f32 to vector<8x4xf32>
    %41 = arith.addf %39, %40 : vector<8x4xf32>
    %42 = arith.mulf %41, %37 : vector<8x4xf32>
    %cst_14 = arith.constant -0.0170881264 : f32
    %43 = vector.broadcast %cst_14 : f32 to vector<8x4xf32>
    %44 = arith.addf %42, %43 : vector<8x4xf32>
    %45 = arith.mulf %44, %37 : vector<8x4xf32>
    %cst_15 = arith.constant 0.0308918804 : f32
    %46 = vector.broadcast %cst_15 : f32 to vector<8x4xf32>
    %47 = arith.addf %45, %46 : vector<8x4xf32>
    %48 = arith.mulf %47, %37 : vector<8x4xf32>
    %cst_16 = arith.constant -0.0501743034 : f32
    %49 = vector.broadcast %cst_16 : f32 to vector<8x4xf32>
    %50 = arith.addf %48, %49 : vector<8x4xf32>
    %51 = arith.mulf %50, %37 : vector<8x4xf32>
    %cst_17 = arith.constant 0.0889789909 : f32
    %52 = vector.broadcast %cst_17 : f32 to vector<8x4xf32>
    %53 = arith.addf %51, %52 : vector<8x4xf32>
    %54 = arith.mulf %53, %37 : vector<8x4xf32>
    %cst_18 = arith.constant -0.214598805 : f32
    %55 = vector.broadcast %cst_18 : f32 to vector<8x4xf32>
    %56 = arith.addf %54, %55 : vector<8x4xf32>
    %57 = arith.mulf %56, %37 : vector<8x4xf32>
    %cst_19 = arith.constant 1.57079625 : f32
    %58 = vector.broadcast %cst_19 : f32 to vector<8x4xf32>
    %59 = arith.addf %57, %58 : vector<8x4xf32>
    %cst_20 = arith.constant 1.000000e+00 : f32
    %60 = vector.broadcast %cst_20 : f32 to vector<8x4xf32>
    %61 = arith.subf %60, %37 : vector<8x4xf32>
    %cst_21 = arith.constant 0.000000e+00 : f32
    %62 = vector.broadcast %cst_21 : f32 to vector<8x4xf32>
    %63 = arith.maximumf %61, %62 : vector<8x4xf32>
    %64 = math.sqrt %63 : vector<8x4xf32>
    %65 = arith.mulf %64, %59 : vector<8x4xf32>
    %cst_22 = arith.constant 1.57079637 : f32
    %66 = vector.broadcast %cst_22 : f32 to vector<8x4xf32>
    %67 = arith.subf %66, %65 : vector<8x4xf32>
    %68 = arith.mulf %67, %67 : vector<8x4xf32>
    %cst_23 = arith.constant 2.000000e+00 : f32
    %69 = vector.broadcast %cst_23 : f32 to vector<8x4xf32>
    %70 = arith.mulf %69, %68 : vector<8x4xf32>
    %cst_24 = arith.constant dense<0.000000e+00> : vector<8xf32>
    %71 = vector.multi_reduction <add>, %70, %cst_24 [1] : vector<8x4xf32> to vector<8xf32>
    %72 = vector.shape_cast %71 : vector<8xf32> to vector<8x1xf32>
    %cst_25 = arith.constant 0.000000e+00 : f32
    %73 = vector.broadcast %cst_25 : f32 to vector<8x1xf32>
    %74 = arith.select %9, %72, %73 : vector<8x1xi1>, vector<8x1xf32>
    %c0_26 = arith.constant 0 : index
    %c0_27 = arith.constant 0 : index
    %75 = vector.load %arg6[%c0_26, %c0_27] : memref<1x1xf32, #tpu.memory_space<vmem>>, vector<1x1xf32>
    %cst_28 = arith.constant dense<0.000000e+00> : vector<1xf32>
    %76 = vector.multi_reduction <add>, %74, %cst_28 [0] : vector<8x1xf32> to vector<1xf32>
    %77 = vector.shape_cast %76 : vector<1xf32> to vector<1x1xf32>
    %78 = arith.addf %75, %77 : vector<1x1xf32>
    %c0_29 = arith.constant 0 : index
    %c0_30 = arith.constant 0 : index
    %79 = vector.load %arg6[%c0_29, %c0_30] : memref<1x1xf32, #tpu.memory_space<vmem>>, vector<1x1xf32>
    tpu.vector_store %arg6[%c0_29, %c0_30], %78 {strides = array<i32>} : memref<1x1xf32, #tpu.memory_space<vmem>>, vector<1x1xf32>,
    %c2_i32 = arith.constant 2 : i32
    %80 = arith.cmpi eq, %arg0, %c2_i32 : i32
    %81 = arith.extui %80 : i1 to i32
    %c0_i32_31 = arith.constant 0 : i32
    %82 = arith.cmpi ne, %81, %c0_i32_31 : i32
    scf.if %82 {
      %c0_32 = arith.constant 0 : index
      %c0_33 = arith.constant 0 : index
      %83 = memref.load %arg1[%c0_32, %c0_33] : memref<1x1xf32, #tpu.memory_space<smem>>
      %c0_34 = arith.constant 0 : index
      %c0_35 = arith.constant 0 : index
      %84 = vector.load %arg6[%c0_34, %c0_35] : memref<1x1xf32, #tpu.memory_space<vmem>>, vector<1x1xf32>
      %85 = vector.broadcast %83 : f32 to vector<1x1xf32>
      %86 = arith.mulf %85, %84 : vector<1x1xf32>
      %cst_36 = arith.constant 1.250000e-02 : f32
      %87 = vector.broadcast %cst_36 : f32 to vector<1x1xf32>
      %88 = arith.mulf %86, %87 : vector<1x1xf32>
      %c0_37 = arith.constant 0 : index
      %c0_38 = arith.constant 0 : index
      %89 = vector.load %arg5[%c0_37, %c0_38] : memref<1x1xf32, #tpu.memory_space<vmem>>, vector<1x1xf32>
      tpu.vector_store %arg5[%c0_37, %c0_38], %88 {strides = array<i32>} : memref<1x1xf32, #tpu.memory_space<vmem>>, vector<1x1xf32>,
    } else {
    }
    return
  }
  func.func @transform_0(%arg0: i32) -> (i32, i32) {
    %c0_i32 = arith.constant 0 : i32
    %c0_i32_0 = arith.constant 0 : i32
    %c0_i32_1 = arith.constant 0 : i32
    return %c0_i32, %c0_i32_0 : i32, i32
  }
  func.func @transform_1(%arg0: i32) -> (i32, i32) {
    %c0_i32 = arith.constant 0 : i32
    %c0_i32_0 = arith.constant 0 : i32
    return %arg0, %c0_i32 : i32, i32
  }
  func.func @transform_2(%arg0: i32) -> (i32, i32) {
    %c0_i32 = arith.constant 0 : i32
    %c0_i32_0 = arith.constant 0 : i32
    %c0_i32_1 = arith.constant 0 : i32
    return %c0_i32, %c0_i32_0 : i32, i32
  }
  func.func @transform_3(%arg0: i32) -> (i32, i32) {
    %c0_i32 = arith.constant 0 : i32
    %c0_i32_0 = arith.constant 0 : i32
    %c0_i32_1 = arith.constant 0 : i32
    return %c0_i32, %c0_i32_0 : i32, i32
  }
  func.func @transform_4(%arg0: i32) -> (i32, i32) {
    %c0_i32 = arith.constant 0 : i32
    %c0_i32_0 = arith.constant 0 : i32
    %c0_i32_1 = arith.constant 0 : i32
    return %c0_i32, %c0_i32_0 : i32, i32
  }
}

</mosaic_0001>

<bundles_post_ra>
// kernel: tpu_custom_call.1
= control target key start
LH: loop header
LB: loop body
LE: loop exit
PB: predicated region body
PF: predicated region fallthrough
CT: control target
= control target key end

     0   :  { %s772_s0 = inlined_call_operand.<no memory space> [shape: f32[1,1], index: 0, kind: input, shape index: {}]   ;;  %s773_s1 = inlined_call_operand.hbm [shape: f32[20,128], index: 1, kind: input, shape index: {}]   ;;  %s774_s2 = inlined_call_operand.vmem [shape: f32[4,128], index: 2, kind: input, shape index: {}]   ;;  %s775_s3 = inlined_call_operand.vmem [shape: f32[1,4], index: 3, kind: input, shape index: {}]   ;;  %s776_s4 = inlined_call_operand.hbm [shape: f32[1,1], index: 4, kind: output, shape index: {}]  }
   0x1   :  { %9 = sst [smem:[#allocation3]] %s772_s0 }
   0x2   :  { %10 = vsyncpa [#allocation5], 0 }
   0x3   :  { %12 = vsyncpa [#allocation5 + $0x1], 0 }
   0x4   :  { %13 = vsyncpa [#allocation6], 0  ;;  %s631_s17 = smov 0   ;;  %s633_s18 = smov 0  }
   0x5   :  { %s635_s19 = smov 0   ;;  %s637_s20 = smov 0  }
   0x6 LB: > { %s650_s0 = sadd.s32 4294967295, %s596_s20   ;;  %s653_s21 = sadd.s32 1, %s596_s20   ;;  %s596_s20 = sphi %s637_s20, %s784_s20   ;;  %s592_s19 = sphi %s635_s19, %s783_s19   ;;  %s588_s18 = sphi %s633_s18, %s782_s18   ;;  %s584_s17 = sphi %s631_s17, %s781_s17  }
   0x7   : > { %s44_s22 = ssub.s32 %s596_s20, %s653_s21  ;;  %s47_s23 = sadd.s32 1, %s592_s19 }
   0x8   : > { %p45_p0 = scmp.eq.s32.totalorder %s44_s22, 0  ;;  %p54_p1 = scmp.ne.s32.totalorder %s592_s19, %s588_s18 }
   0x9   : > { %p55_p2 = scmp.eq.s32.totalorder %s596_s20, 0  ;;  %p60_p3 = scmp.ne.s32.totalorder %s588_s18, %s584_s17 }
   0xa   : > { %s663_s24 = scalar_select %p45_p0, %s592_s19, %s47_s23  }
   0xb   : > { %p56_p4 = por %p55_p2, %p54_p1  ;;  %p61_p5 = scmp.eq.s32.totalorder %s650_s0, 0 }
   0xc   : > { %p457_p6 = scmp.lt.s32.totalorder %s596_s20, 3  ;;  %s156_s26 = sand.u32 1, %s592_s19  }
   0xd   : > { %p667_p7 = por %p61_p5, %p60_p3  ;;  %s428_s27 = sshll.u32 %s156_s26, 3 }
   0xe   : > { %s429_s28 = sshll.u32 %s596_s20, 7  ;;  %s160_s6 = scalar_lea.vmem [#allocation4], %s428_s27 }
   0xf   : > { %s676_s5 = scalar_lea.hbm %s773_s1, %s429_s28  ;;  %s167_s7 = sshll.u32 %s160_s6, 4  ;;  %s678_s7 = int_to_ptr.vmem [resolvable:$true] %s167_s7 }
  0x10   : > { %p680_p8 = pnand %p457_p6, %p56_p4  ;;  %s157_s9 = scalar_lea.sflag [#allocation5], %s156_s26 }
  0x11   : > { %s502_s10 = scalar_lea.hbm %s676_s5, 128  ;;  %s507_s13 = scalar_lea.hbm %s773_s1, 384 }
  0x12   : > { %p503_p11 = scmp.ne.s32.totalorder %s676_s5, %s502_s10  ;;  %p504_p12 = pneg %p680_p8 }
  0x13   : > { %p508_p1 = scmp.lt.u32.totalorder %s676_s5, %s773_s1  ;;  %p509_p2 = scmp.lt.u32.totalorder %s507_s13, %s502_s10 }
  0x14   : > { %p505_p13 = pnand %p504_p12, %p503_p11  ;;  %p511_p4 = scmp.lt.u32.totalorder %s502_s10, %s676_s5 }
  0x15   : > { %p510_p3 = por %p509_p2, %p508_p1 }
  0x16   : > { %p506_p0 = pneg %p505_p13 }
  0x17   : > { %p512_p5 = por %p511_p4, %p510_p3 }
  0x19   : > { %p513_p6 = pnand %p512_p5, %p506_p0 }
  0x1b   : > { %516 = shalt.err (!%p513_p6)
}
  0x1c   : > { %s517_s16 = scalar_lea.vmem %s678_s7, 128  ;;  %s598_s17 = smov [#allocation4]  }
  0x1d   : > { %p518_p11 = scmp.ne.s32.totalorder %s678_s7, %s517_s16  ;;  %s522_s22 = sshll.u32 %s598_s17, 4  ;;  %s523_s22 = int_to_ptr.vmem [resolvable:$false] %s522_s22 }
  0x1e   : > { %s524_s23 = scalar_lea.vmem %s523_s22, 256  ;;  %p525_p10 = scmp.lt.s32.totalorder %s678_s7, %s523_s22 }
  0x1f   : > { %p520_p13 = pnand %p518_p11, %p504_p12  ;;  %p526_p1 = scmp.lt.s32.totalorder %s524_s23, %s517_s16 }
  0x21   : > { %p521_p9 = pneg %p520_p13  ;;  %p527_p2 = por %p526_p1, %p525_p10 }
  0x23   : > { %p528_p3 = pnand %p527_p2, %p521_p9 }
  0x25   : > { %531 = shalt.err (!%p528_p3)
}
  0x26   : > { %456 = dma.hbm_to_vmem [thread:$0]  (!%p680_p8), %s676_s5, 128, %s678_s7, %s157_s9  }
  0x27   : > { %p779_p0 = scmp.lt.s32.totalorder %s596_s20, 4  ;;  %p780_p4 = scmp.ge.s32.totalorder %s596_s20, 1 }
  0x29   : > { %p173_p12 = pnand %p780_p4, %p779_p0 }
  0x2a   : > { %s178_s26 = sand.u32 (!%p173_p12), 1, %s588_s18  }
  0x2b   : > { %176 = sbr.rel (%p173_p12) target bundleno = 692 (0x2b4), region = 36  ;;  %s431_s27 = sshll.u32 (!%p173_p12), %s178_s26, 3 }
  0x2c   : > { %s179_s28 = scalar_lea.sflag (!%p173_p12), [#allocation5], %s178_s26  ;;  %s182_s29 = scalar_lea.vmem (!%p173_p12), [#allocation4], %s431_s27 }
  0x32   : > { %575 = dma.done.wait (%p667_p7), %s179_s28, 128  }
  0x33   : > { %577 = vsyncadd (%p667_p7), %s179_s28, 4294967168  ;;  %p432_p9 = scmp.ne.s32.totalorder %s650_s0, 0 }
  0x34   : > { %vm206_vm0 = vcmask (!%p432_p9), 0   ;;  %v599_v0 = vmov (!%p432_p9), 0.0  }
  0x35   : > { %205 = sbr.rel (%p432_p9) target bundleno = 60 (0x3c), region = 44  ;;  %207 = vst.msk [vmem:[#allocation2] sm:$0x1] (!%p432_p9), %vm206_vm0, %v599_v0 }
  0x3c PF: > { %s433_s20 = sshll.u32 %s650_s0, 3  ;;  %v210_v1 = vlaneseq  ;;  %v208_v4 = vld [vmem:[%s182_s29] sm:$0xff]  ;;  %v600_v8 = vmov 0.0   ;;  %vm601_vm2 = vmmov 0   ;;  %v434_v17 = vld [vmem:[%s775_s3] ss:$0 sm:$0xff] }
  0x3d   : > { %v212_v2 = vstv %s433_s20  ;;  %442 = vmatprep.subr.mxu0 %v600_v8  ;;  %v227_v9 = vld [vmem:[%s774_s2] sm:$0xf]  ;;  %444 = vmatprep.mubr.msk.f32.mxu0 %vm601_vm2, %v600_v8  ;;  %vm343_vm7 = vcmask 31744   ;;  %vm356_vm8 = vcmask 0   ;;  %p435_p7 = scmp.ne.s32.totalorder %s650_s0, 2 }
  0x3e   : > { %v211_v3 = vshrl.u32 %v210_v1, 7  ;;  %443 = vmatpush3.xpose.msra.mxu0 %v227_v9  ;;  %v348_v62 = vld [vmem:[#allocation2] sm:$0x1]  ;;  %s362_s7 = sld [smem:[#allocation3]] (!%p435_p7) }
  0x40   : > { %v722_v5 = vadd.s32 %v212_v2, %v211_v3 }
  0x42   : > { %vm214_vm1 = vcmp.lt.s32.totalorder %v722_v5, 20 }
  0x43   : > { %v217_v6 = vsel %vm214_vm1, %v208_v4, 0.0 }
  0x44   : > { %v218_v7 = vmul.f32 %v217_v6, %v217_v6  ;;  %v364_v2 = vstv (!%p435_p7), %s362_s7 }
  0x46   : > { %219 = vadd.xlane.f32.xlu0 %v218_v7 }
  0xd3   : > { %v220_v10 = vpop.xlane.xlu0 %219 }
  0xd4   : > { %v221_v11 = vmax.f32 %v220_v10, 1e-24 }
  0xd6   : > { %496 = vrsqrt.f32 %v221_v11 }
  0xe0   : > { %v497_v12 = vpop.eup %496 }
  0xe1   : > { %v223_v13 = vmul.f32 %v497_v12, %v217_v6  ;;  %v224_v14 = vmul.f32 %v497_v12, %v497_v12 }
  0xe3   : > { %445 = vmatmul.mubr.f32.vlgmr.msra.gmra.mrb[0].mxu0 %v223_v13  ;;  %v225_v15 = vmul.f32 %v224_v14, %v220_v10 }
  0xe5   : > { %v226_v16 = vmul.f32 0.25, %v225_v15 }
  0xe7   : > { %v305_v19 = vadd.f32 %v434_v17, %v226_v16 }
 0x1b6   : > { %v294_v18 = vpop.f32.mrb[0].mxu0 }
 0x1b7   : > { %v306_v20 = vmul.f32 0.5, %v294_v18  ;;  %v446_v21 = vpop.f32.mrb[1].mxu0 }
 0x1b9   : > { %v307_v22 = vsub.f32 %v305_v19, %v306_v20 }
 0x1bb   : > { %v308_v23 = vmax.f32 %v307_v22, 0.0 }
 0x1bd   : > { %498 = vrsqrt.f32 %v308_v23  ;;  %vm311_vm3 = vcmp.eq.f32.partialorder %v308_v23, inf  ;;  %v314_v26 = vand.u32 2147483648, %v308_v23  ;;  %vm313_vm4 = vcmp.eq.f32.partialorder %v308_v23, 0.0 }
 0x1c7   : > { %v499_v24 = vpop.eup %498 }
 0x1c8   : > { %v310_v25 = vmul.f32 %v499_v24, %v308_v23 }
 0x1ca   : > { %v312_v27 = vsel %vm311_vm3, %v308_v23, %v310_v25 }
 0x1cb   : > { %v315_v28 = vsel %vm313_vm4, %v314_v26, %v312_v27 }
 0x1cc   : > { %v316_v29 = vmul.f32 -0.0012624911, %v315_v28  ;;  %v330_v30 = vsub.f32 1.0, %v315_v28 }
 0x1ce   : > { %v317_v31 = vadd.f32 0.00667009, %v316_v29  ;;  %v331_v32 = vmax.f32 %v330_v30, 0.0 }
 0x1d0   : > { %v318_v33 = vmul.f32 %v317_v31, %v315_v28  ;;  %500 = vrsqrt.f32 %v331_v32  ;;  %vm334_vm5 = vcmp.eq.f32.partialorder %v331_v32, inf  ;;  %v337_v47 = vand.u32 2147483648, %v331_v32 }
 0x1d1   : > { %vm336_vm6 = vcmp.eq.f32.partialorder %v331_v32, 0.0 }
 0x1d2   : > { %v319_v34 = vadd.f32 -0.017088126, %v318_v33 }
 0x1d4   : > { %v320_v35 = vmul.f32 %v319_v34, %v315_v28 }
 0x1d6   : > { %v321_v36 = vadd.f32 0.03089188, %v320_v35 }
 0x1d8   : > { %v322_v37 = vmul.f32 %v321_v36, %v315_v28 }
 0x1da   : > { %v323_v38 = vadd.f32 -0.050174303, %v322_v37  ;;  %v501_v40 = vpop.eup %500 }
 0x1db   : > { %v333_v43 = vmul.f32 %v501_v40, %v331_v32 }
 0x1dc   : > { %v324_v39 = vmul.f32 %v323_v38, %v315_v28 }
 0x1dd   : > { %v335_v46 = vsel %vm334_vm5, %v331_v32, %v333_v43 }
 0x1de   : > { %v325_v41 = vadd.f32 0.08897899, %v324_v39  ;;  %v338_v49 = vsel %vm336_vm6, %v337_v47, %v335_v46 }
 0x1e0   : > { %v326_v42 = vmul.f32 %v325_v41, %v315_v28 }
 0x1e2   : > { %v327_v44 = vadd.f32 -0.2145988, %v326_v42 }
 0x1e4   : > { %v328_v45 = vmul.f32 %v327_v44, %v315_v28 }
 0x1e6   : > { %v329_v48 = vadd.f32 1.5707963, %v328_v45 }
 0x1e8   : > { %v339_v50 = vmul.f32 %v338_v49, %v329_v48 }
 0x1ea   : > { %v340_v51 = vsub.f32 1.5707964, %v339_v50 }
 0x1ec   : > { %v341_v52 = vmul.f32 %v340_v51, %v340_v51 }
 0x1ee   : > { %v342_v53 = vmul.f32 2.0, %v341_v52 }
 0x1f0   : > { %v344_v54 = vsel %vm343_vm7, %v342_v53, 0.0 }
 0x1f1   : > { %345 = vadd.xlane.f32.xlu0 %v344_v54 }
 0x27e   : > { %v346_v55 = vpop.xlane.xlu0 %345 }
 0x27f   : > { %v347_v56 = vsel %vm214_vm1, %v346_v55, 0.0 }
 0x280   : > { %v349_v57 = vrot.slane %v347_v56, 4 }
 0x282   : > { %v350_v58 = vadd.f32 %v349_v57, %v347_v56 }
 0x284   : > { %v351_v59 = vrot.slane %v350_v58, 2 }
 0x286   : > { %v352_v60 = vadd.f32 %v351_v59, %v350_v58 }
 0x288   : > { %v353_v61 = vrot.slane %v352_v60, 1  ;;  %361 = sbr.rel (%p435_p7) target bundleno = 667 (0x29b), region = 48 }
 0x28a   : > { %v354_v63 = vadd.f32 %v353_v61, %v352_v60 }
 0x28c   : > { %v355_v0 = vadd.f32 %v354_v63, %v348_v62 }
 0x28e   : > { %357 = vst.msk [vmem:[#allocation2] sm:$0x1] %vm356_vm8, %v355_v0 }
 0x295   : > { %v363_v1 = vld [vmem:[#allocation2] sm:$0x1] }
 0x296   : > { %v365_v3 = vmul.f32 %v364_v2, %v363_v1 }
 0x298   : > { %v366_v4 = vmul.f32 0.0125, %v365_v3 }
 0x29a   : > { %367 = vst.msk [vmem:[#allocation7] sm:$0x1] %vm356_vm8, %v366_v4 }
 0x29b PF: > { %p458_p8 = scmp.eq.s32.totalorder %s650_s0, 2  ;;  %s602_s8 = smov [#allocation7]  }
 0x29c   : > { %s375_s9 = sshll.u32 %s602_s8, 4  ;;  %s376_s9 = int_to_ptr.vmem [resolvable:$true] %s375_s9 }
 0x29d   : > { %s532_s10 = scalar_lea.vmem %s376_s9, 16  ;;  %s538_s11 = scalar_lea.vmem %s376_s9, 32 }
 0x29e   : > { %p533_p10 = scmp.ne.s32.totalorder %s376_s9, %s532_s10  ;;  %p539_p11 = scmp.lt.s32.totalorder %s376_s9, %s376_s9 }
 0x29f   : > { %p540_p13 = scmp.lt.s32.totalorder %s538_s11, %s532_s10 }
 0x2a0   : > { %p534_p5 = pnand %p533_p10, %p458_p8 }
 0x2a1   : > { %p541_p1 = por %p540_p13, %p539_p11 }
 0x2a2   : > { %p535_p6 = pneg %p534_p5 }
 0x2a4   : > { %p542_p2 = pnand %p541_p1, %p535_p6 }
 0x2a6   : > { %545 = shalt.err (!%p542_p2)
}
 0x2a7   : > { %s546_s14 = scalar_lea.hbm %s776_s4, 16 }
 0x2a8   : > { %p547_p3 = scmp.ne.s32.totalorder %s776_s4, %s546_s14  ;;  %p552_p12 = scmp.lt.u32.totalorder %s546_s14, %s776_s4 }
 0x2aa   : > { %p548_p0 = pnand %p547_p3, %p458_p8 }
 0x2ac   : > { %p549_p4 = pneg %p548_p0 }
 0x2ae   : > { %p554_p9 = pnand %p552_p12, %p549_p4 }
 0x2b0   : > { %557 = shalt.err (!%p554_p9)
}
 0x2b1   : > { %450 = dma.vmem_to_hbm [thread:$0]  (%p458_p8), %s376_s9, 16, %s776_s4, [#allocation6]  }
 0x2b2   : > { %579 = dma.done.wait (%p458_p8), [#allocation6], 16  }
 0x2b3   : > { %581 = vsyncadd (%p458_p8), [#allocation6], 4294967280 }
 0x2b4 PF: > { %p16_p7 = scmp.ge.s32.totalorder %s653_s21, 5   ;;  %s781_s17 = smov %s588_s18 }
 0x2b5   : > { %s782_s18 = smov %s592_s19  ;;  %s783_s19 = smov %s663_s24 }
 0x2b6   : > { %s784_s20 = smov %s653_s21  ;;  %18 = sbr.rel (!%p16_p7) target bundleno = 6 (0x6), region = 81 }
 0x2bd   :  { %388 = vsyncpa [#allocation5], 1 }
 0x2be   :  { %390 = vsyncpa [#allocation5 + $0x1], 1 }
 0x2bf   :  { %391 = vsyncpa [#allocation6], 1 }
 0x2c0   :  { %393 = vsyncpa [#allocation6 + $0x1], 1 }

</bundles_post_ra>
